<compile_context>
chip_gen: v7x
topology: tpu7x:2x2x1
jax: 0.10.0
libtpu: 0.0.40
codegen_flags: <defaults>
</compile_context>

<pallas_src>
import functools

import jax
import jax.numpy as jnp
from jax.experimental import pallas as pl
from jax.experimental.pallas import tpu as pltpu


def _mlp_kernel(xT_ref, uT_ref, w1x_ref, w1u_ref, b1_ref, w2_ref, b2_ref, dxT_ref):
    # hidden^T = tanh(W1x @ x^T + W1u @ u^T + b1)        -> (hidden, TB)
    h = jnp.dot(w1x_ref[...], xT_ref[...], preferred_element_type=jnp.float32)
    h = h + jnp.dot(w1u_ref[...], uT_ref[...], preferred_element_type=jnp.float32)
    h = jnp.tanh(h + b1_ref[...])                        # b1 is (hidden, 1): lane bcast
    # dx^T = W2 @ hidden^T + b2                          -> (n_x, TB)
    dx = jnp.dot(w2_ref[...], h, preferred_element_type=jnp.float32) + b2_ref[...]
    dxT_ref[...] = dx.astype(dxT_ref.dtype)


def _round_up(a, b):
    return ((a + b - 1) // b) * b


@functools.partial(jax.jit, static_argnames=("batch_tile",))
def neural_state_update(x, u, w1, b1, w2, b2, *, batch_tile=512):
    """Pallas forward of NeuralStateUpdate.

    x: (B, n_x), u: (B, n_u)                      (PyTorch batch-major convention)
    w1: (hidden, n_x + n_u), b1: (hidden,)        (nn.Linear weight/bias shapes)
    w2: (n_x, hidden),       b2: (n_x,)
    Returns dx: (B, n_x).
    """
    B, n_x = x.shape
    n_u = u.shape[1]
    hidden = w1.shape[0]

    # --- layout plumbing (wrapper-side): lane-dense (feature, batch) layout -------
    # Batch tile: lane dim must be a multiple of 128; cap at `batch_tile`.
    tb = min(batch_tile, _round_up(B, 128))
    b_pad = _round_up(B, tb)
    xT = jnp.pad(x.T, ((0, 0), (0, b_pad - B)))           # (n_x, B_pad)
    uT = jnp.pad(u.T, ((0, 0), (0, b_pad - B)))           # (n_u, B_pad)

    # Split W1 so no concat of x/u is ever materialized in HBM.
    w1x = w1[:, :n_x]                                     # (hidden, n_x)
    w1u = w1[:, n_x:]                                     # (hidden, n_u)
    b1_2d = b1.reshape(hidden, 1)                         # broadcast along lanes (batch)
    b2_2d = b2.reshape(n_x, 1)

    grid = (b_pad // tb,)

    # Memory-bound kernel: advertise the (tiny) flops and real byte traffic.
    flops = 2 * b_pad * hidden * (n_x + n_u + n_x)
    bytes_accessed = 4 * (
        b_pad * (n_x + n_u)                # inputs
        + b_pad * n_x                      # output
        + hidden * (n_x + n_u + 1)         # W1 + b1
        + n_x * (hidden + 1)               # W2 + b2
    )
    cost = pl.CostEstimate(
        flops=flops, transcendentals=b_pad * hidden, bytes_accessed=bytes_accessed
    )

    dxT = pl.pallas_call(
        _mlp_kernel,
        out_shape=jax.ShapeDtypeStruct((n_x, b_pad), x.dtype),
        grid=grid,
        in_specs=[
            pl.BlockSpec((n_x, tb), lambda i: (0, i)),        # x^T  batch tile
            pl.BlockSpec((n_u, tb), lambda i: (0, i)),        # u^T  batch tile
            pl.BlockSpec((hidden, n_x), lambda i: (0, 0)),    # W1x  (resident)
            pl.BlockSpec((hidden, n_u), lambda i: (0, 0)),    # W1u  (resident)
            pl.BlockSpec((hidden, 1), lambda i: (0, 0)),      # b1   (resident)
            pl.BlockSpec((n_x, hidden), lambda i: (0, 0)),    # W2   (resident)
            pl.BlockSpec((n_x, 1), lambda i: (0, 0)),         # b2   (resident)
        ],
        out_specs=pl.BlockSpec((n_x, tb), lambda i: (0, i)),  # dx^T batch tile
        compiler_params=pltpu.CompilerParams(
            dimension_semantics=("parallel",),                 # megacore on v7x
            vmem_limit_bytes=32 * 1024 * 1024,                 # tiles are tiny; safe on v7x's 64 MiB
        ),
        cost_estimate=cost,
    )(xT, uT, w1x, w1u, b1_2d, w2, b2_2d)

    # Back to the PyTorch (batch, feature) convention; drop batch padding.
    return dxT[:, :B].T


def init_params(key, n_x, n_u, hidden_size, init_small=True):
    """Init matching the PyTorch module (normal std 1e-4, zero bias), nn.Linear shapes."""
    k1, k2 = jax.random.split(key)
    std = 1e-4 if init_small else 1.0
    w1 = std * jax.random.normal(k1, (hidden_size, n_x + n_u), dtype=jnp.float32)
    b1 = jnp.zeros((hidden_size,), dtype=jnp.float32)
    w2 = std * jax.random.normal(k2, (n_x, hidden_size), dtype=jnp.float32)
    b2 = jnp.zeros((n_x,), dtype=jnp.float32)
    return w1, b1, w2, b2


if __name__ == "__main__":
    key = jax.random.PRNGKey(0)
    kx, ku, kp = jax.random.split(key, 3)

    B, n_x, n_u, hidden = 8, 4, 2, 32
    x = jax.random.normal(kx, (B, n_x), dtype=jnp.float32)
    u = jax.random.normal(ku, (B, n_u), dtype=jnp.float32)
    w1, b1, w2, b2 = init_params(kp, n_x, n_u, hidden)

    dx = neural_state_update(x, u, w1, b1, w2, b2)
    dx = jax.block_until_ready(dx)

    # Pure-JAX reference (PyTorch semantics: dx = Linear2(tanh(Linear1(cat(x, u))))).
    xu = jnp.concatenate([x, u], axis=-1)
    dx_ref = jnp.tanh(xu @ w1.T + b1) @ w2.T + b2
    assert dx.shape == (B, n_x)
    assert jnp.allclose(dx, dx_ref, atol=1e-6, rtol=1e-5), "mismatch vs reference"

    # Also exercise a multi-tile batch (grid > 1, remainder handling).
    B2 = 1000
    x2 = jax.random.normal(kx, (B2, n_x), dtype=jnp.float32)
    u2 = jax.random.normal(ku, (B2, n_u), dtype=jnp.float32)
    dx2 = jax.block_until_ready(neural_state_update(x2, u2, w1, b1, w2, b2))
    xu2 = jnp.concatenate([x2, u2], axis=-1)
    dx2_ref = jnp.tanh(xu2 @ w1.T + b1) @ w2.T + b2
    assert dx2.shape == (B2, n_x)
    assert jnp.allclose(dx2, dx2_ref, atol=1e-6, rtol=1e-5), "mismatch vs reference (B=1000)"

    print("KERNEL_OK")
</pallas_src>

<mosaic_0001>
module attributes {stable_mosaic.version = 11 : i64} {
  func.func @_mlp_kernel(%arg0: i32, %arg1: memref<4x128xf32, #tpu.memory_space<vmem>>, %arg2: memref<2x128xf32, #tpu.memory_space<vmem>>, %arg3: memref<32x4xf32, #tpu.memory_space<vmem>>, %arg4: memref<32x2xf32, #tpu.memory_space<vmem>>, %arg5: memref<32x1xf32, #tpu.memory_space<vmem>>, %arg6: memref<4x32xf32, #tpu.memory_space<vmem>>, %arg7: memref<4x1xf32, #tpu.memory_space<vmem>>, %arg8: memref<4x128xf32, #tpu.memory_space<vmem>>) attributes {dimension_semantics = [#tpu.dimension_semantics<parallel>], iteration_bounds = array<i64: 1>, scalar_prefetch = 0 : i64, scratch_operands = 0 : i64, tpu.core_type = #tpu.core_type<tc>, window_params = [{transform_indices = @transform_0, window_bounds = array<i64: 4, 128>}, {transform_indices = @transform_1, window_bounds = array<i64: 2, 128>}, {pipeline_mode = #tpu.pipeline_mode<synchronous>, transform_indices = @transform_2, window_bounds = array<i64: 32, 4>}, {pipeline_mode = #tpu.pipeline_mode<synchronous>, transform_indices = @transform_3, window_bounds = array<i64: 32, 2>}, {pipeline_mode = #tpu.pipeline_mode<synchronous>, transform_indices = @transform_4, window_bounds = array<i64: 32, 1>}, {pipeline_mode = #tpu.pipeline_mode<synchronous>, transform_indices = @transform_5, window_bounds = array<i64: 4, 32>}, {pipeline_mode = #tpu.pipeline_mode<synchronous>, transform_indices = @transform_6, window_bounds = array<i64: 4, 1>}, {transform_indices = @transform_7, window_bounds = array<i64: 4, 128>}]} {
    %c0 = arith.constant 0 : index
    %c0_0 = arith.constant 0 : index
    %0 = vector.load %arg3[%c0, %c0_0] : memref<32x4xf32, #tpu.memory_space<vmem>>, vector<32x4xf32>
    %c0_1 = arith.constant 0 : index
    %c0_2 = arith.constant 0 : index
    %1 = vector.load %arg1[%c0_1, %c0_2] : memref<4x128xf32, #tpu.memory_space<vmem>>, vector<4x128xf32>
    %cst = arith.constant dense<0.000000e+00> : vector<32x128xf32>
    %2 = tpu.matmul %0, %1, %cst {dimension_numbers = #tpu.dot_dimension_numbers<[1], [0], [0], [1], [0, 0, 1, 1], [], []>} : vector<32x4xf32>, vector<4x128xf32>, vector<32x128xf32> -> vector<32x128xf32>
    %c0_3 = arith.constant 0 : index
    %c0_4 = arith.constant 0 : index
    %3 = vector.load %arg4[%c0_3, %c0_4] : memref<32x2xf32, #tpu.memory_space<vmem>>, vector<32x2xf32>
    %c0_5 = arith.constant 0 : index
    %c0_6 = arith.constant 0 : index
    %4 = vector.load %arg2[%c0_5, %c0_6] : memref<2x128xf32, #tpu.memory_space<vmem>>, vector<2x128xf32>
    %cst_7 = arith.constant dense<0.000000e+00> : vector<32x128xf32>
    %5 = tpu.matmul %3, %4, %cst_7 {dimension_numbers = #tpu.dot_dimension_numbers<[1], [0], [0], [1], [0, 0, 1, 1], [], []>} : vector<32x2xf32>, vector<2x128xf32>, vector<32x128xf32> -> vector<32x128xf32>
    %6 = arith.addf %2, %5 : vector<32x128xf32>
    %c0_8 = arith.constant 0 : index
    %c0_9 = arith.constant 0 : index
    %7 = vector.load %arg5[%c0_8, %c0_9] : memref<32x1xf32, #tpu.memory_space<vmem>>, vector<32x1xf32>
    %8 = vector.broadcast %7 : vector<32x1xf32> to vector<32x128xf32>
    %9 = arith.addf %6, %8 : vector<32x128xf32>
    %10 = math.tanh %9 : vector<32x128xf32>
    %c0_10 = arith.constant 0 : index
    %c0_11 = arith.constant 0 : index
    %11 = vector.load %arg6[%c0_10, %c0_11] : memref<4x32xf32, #tpu.memory_space<vmem>>, vector<4x32xf32>
    %cst_12 = arith.constant dense<0.000000e+00> : vector<4x128xf32>
    %12 = tpu.matmul %11, %10, %cst_12 {dimension_numbers = #tpu.dot_dimension_numbers<[1], [0], [0], [1], [0, 0, 1, 1], [], []>} : vector<4x32xf32>, vector<32x128xf32>, vector<4x128xf32> -> vector<4x128xf32>
    %c0_13 = arith.constant 0 : index
    %c0_14 = arith.constant 0 : index
    %13 = vector.load %arg7[%c0_13, %c0_14] : memref<4x1xf32, #tpu.memory_space<vmem>>, vector<4x1xf32>
    %14 = vector.broadcast %13 : vector<4x1xf32> to vector<4x128xf32>
    %15 = arith.addf %12, %14 : vector<4x128xf32>
    %c0_15 = arith.constant 0 : index
    %c0_16 = arith.constant 0 : index
    %16 = vector.load %arg8[%c0_15, %c0_16] : memref<4x128xf32, #tpu.memory_space<vmem>>, vector<4x128xf32>
    tpu.vector_store %arg8[%c0_15, %c0_16], %15 {strides = array<i32>} : memref<4x128xf32, #tpu.memory_space<vmem>>, vector<4x128xf32>,
    return
  }
  func.func @transform_0(%arg0: i32) -> (i32, i32) {
    %c0_i32 = arith.constant 0 : i32
    %c0_i32_0 = arith.constant 0 : i32
    return %c0_i32, %arg0 : i32, i32
  }
  func.func @transform_1(%arg0: i32) -> (i32, i32) {
    %c0_i32 = arith.constant 0 : i32
    %c0_i32_0 = arith.constant 0 : i32
    return %c0_i32, %arg0 : i32, i32
  }
  func.func @transform_2(%arg0: i32) -> (i32, i32) {
    %c0_i32 = arith.constant 0 : i32
    %c0_i32_0 = arith.constant 0 : i32
    %c0_i32_1 = arith.constant 0 : i32
    return %c0_i32, %c0_i32_0 : i32, i32
  }
  func.func @transform_3(%arg0: i32) -> (i32, i32) {
    %c0_i32 = arith.constant 0 : i32
    %c0_i32_0 = arith.constant 0 : i32
    %c0_i32_1 = arith.constant 0 : i32
    return %c0_i32, %c0_i32_0 : i32, i32
  }
  func.func @transform_4(%arg0: i32) -> (i32, i32) {
    %c0_i32 = arith.constant 0 : i32
    %c0_i32_0 = arith.constant 0 : i32
    %c0_i32_1 = arith.constant 0 : i32
    return %c0_i32, %c0_i32_0 : i32, i32
  }
  func.func @transform_5(%arg0: i32) -> (i32, i32) {
    %c0_i32 = arith.constant 0 : i32
    %c0_i32_0 = arith.constant 0 : i32
    %c0_i32_1 = arith.constant 0 : i32
    return %c0_i32, %c0_i32_0 : i32, i32
  }
  func.func @transform_6(%arg0: i32) -> (i32, i32) {
    %c0_i32 = arith.constant 0 : i32
    %c0_i32_0 = arith.constant 0 : i32
    %c0_i32_1 = arith.constant 0 : i32
    return %c0_i32, %c0_i32_0 : i32, i32
  }
  func.func @transform_7(%arg0: i32) -> (i32, i32) {
    %c0_i32 = arith.constant 0 : i32
    %c0_i32_0 = arith.constant 0 : i32
    return %c0_i32, %arg0 : i32, i32
  }
}

</mosaic_0001>

<bundles_post_ra>
// kernel: neural_state_update.1
= control target key start
LH: loop header
LB: loop body
LE: loop exit
PB: predicated region body
PF: predicated region fallthrough
CT: control target
= control target key end

     0   :  { %vm49_vm0 = vcmask 1041408   ;;  %vm151_vm1 = vcmask 1043456   ;;  %vm36_vm2 = vcmask 15360   ;;  %vm138_vm3 = vcmask 31744   ;;  %s542_s1 = inlined_call_operand.vmem [shape: f32[2,128], index: 1, kind: input, shape index: {}]   ;;  %s543_s0 = inlined_call_operand.vmem [shape: f32[4,128], index: 0, kind: input, shape index: {}]   ;;  %s544_s3 = inlined_call_operand.vmem [shape: f32[32,2], index: 3, kind: input, shape index: {}]   ;;  %s545_s2 = inlined_call_operand.vmem [shape: f32[32,4], index: 2, kind: input, shape index: {}]   ;;  %s546_s4 = inlined_call_operand.vmem [shape: f32[32,1], index: 4, kind: input, shape index: {}]   ;;  %s547_s6 = inlined_call_operand.vmem [shape: f32[4,1], index: 6, kind: input, shape index: {}]   ;;  %s548_s5 = inlined_call_operand.vmem [shape: f32[4,32], index: 5, kind: input, shape index: {}]   ;;  %s549_s7 = inlined_call_operand.vmem [shape: f32[4,128], index: 7, kind: output, shape index: {}]  }
   0x1   :  { %v35_v0 = vld [vmem:[%s542_s1] sm:$0x3]  ;;  %v32_v4 = vld [vmem:[%s544_s3 + $0x8] sm:$0xff]  ;;  %v33_v6 = vld [vmem:[%s544_s3 + $0x10] sm:$0xff]  ;;  %v435_v12 = vmov 0   ;;  %v436_v16 = vmov 0.0|0.0  }
   0x2   :  { %v30_v1 = vld [vmem:[%s543_s0] sm:$0xf]  ;;  %384 = vmatprep.subr.msk.mxu1 %vm49_vm0, %v35_v0  ;;  %v27_v5 = vld [vmem:[%s545_s2 + $0x8] sm:$0xff]  ;;  %v28_v7 = vld [vmem:[%s545_s2 + $0x10] sm:$0xff]  ;;  %425 = vset.pattern.permute.xlu0 %v435_v12  ;;  %vm437_vm4 = vmmov 0   ;;  %v438_v17 = vmov 0.0  }
   0x3   :  { %v31_v2 = vld [vmem:[%s544_s3] sm:$0xff]  ;;  %392 = vmatprep.subr.msk.mxu0 %vm151_vm1, %v30_v1  ;;  %385 = vmatpush3.msk.msra.mxu1 %vm49_vm0, %v35_v0  ;;  %v242_v9 = vld [vmem:[%s546_s4 + $0x10] sm:$0xff]  ;;  %v34_v10 = vld [vmem:[%s544_s3 + $0x18] sm:$0xff]  ;;  %vm279_vm5 = vcmask 261120  }
   0x4   :  { %v26_v3 = vld [vmem:[%s545_s2] sm:$0xff]  ;;  %386 = vmatprep.mubr.msk.f32.mxu1 %vm36_vm2, %v31_v2  ;;  %393 = vmatpush3.msk.msra.mxu0 %vm151_vm1, %v30_v1  ;;  %v29_v11 = vld [vmem:[%s545_s2 + $0x18] sm:$0xff]  ;;  %v241_v13 = vld [vmem:[%s546_s4 + $0x8] sm:$0xff] }
   0x5   :  { %394 = vmatprep.mubr.msk.f32.mxu0 %vm138_vm3, %v26_v3  ;;  %387 = vmatmul.mubr.msk.f32.vlgmr.msra.gmra.mrb[0].mxu1 %vm36_vm2, %v32_v4  ;;  %v240_v8 = vld [vmem:[%s546_s4] sm:$0xff]  ;;  %v243_v14 = vld [vmem:[%s546_s4 + $0x18] sm:$0xff] }
   0x6   :  { %395 = vmatmul.mubr.msk.f32.vlgmr.msra.gmra.mrb[0].mxu0 %vm138_vm3, %v27_v5  ;;  %389 = vmatprep.mubr.msk.f32.mxu1 %vm36_vm2, %v33_v6  ;;  %v273_v15 = vld [vmem:[%s547_s6] sm:$0xf] }
   0x7   :  { %397 = vmatprep.mubr.msk.f32.mxu0 %vm138_vm3, %v28_v7  ;;  %426 = vset.pattern.permute.xlu1 %v435_v12  ;;  %v272_v44 = vld [vmem:[%s548_s5] sm:$0xf] }
   0x8   :  { %246 = vperm.xlu0 %425, %v240_v8   ;;  %256 = vperm.xlu1 %426, %v242_v9  }
   0x9   :  { %390 = vmatmul.mubr.msk.f32.gmra.mrb[2].mxu1 %vm36_vm2, %v34_v10  ;;  %411 = vmatprep.subr.bf16.mxu1 %v436_v16 }
   0xa   :  { %398 = vmatmul.mubr.msk.f32.gmra.mrb[2].mxu0 %vm138_vm3, %v29_v11  ;;  %408 = vmatprep.mubr.msk.f32.mxu1 %vm437_vm4, %v438_v17 }
   0xc   :  { %251 = vperm.xlu0 %425, %v241_v13   ;;  %261 = vperm.xlu1 %426, %v243_v14  }
  0x10   :  { %276 = vperm.xlu0 %425, %v273_v15  }
  0x87   :  { %v247_v18 = vpop.permute.xlu0 %246  ;;  %v257_v19 = vpop.permute.xlu1 %256 }
  0x8b   :  { %v252_v25 = vpop.permute.xlu0 %251  ;;  %v262_v34 = vpop.permute.xlu1 %261 }
  0x8f   :  { %v277_v45 = vpop.permute.xlu0 %276 }
  0xd8   :  { %v388_v20 = vpop.f32.mrb[0].mxu1 }
  0xd9   :  { %v396_v21 = vpop.f32.mrb[0].mxu0  ;;  %v119_v23 = vpop.f32.mrb[1].mxu1 }
  0xda   :  { %v227_v22 = vadd.f32 %v396_v21, %v388_v20  ;;  %v221_v24 = vpop.f32.mrb[1].mxu0 }
  0xdb   :  { %v222_v26 = vadd.f32 %v221_v24, %v119_v23 }
  0xdc   :  { %v265_v27 = vadd.f32 %v252_v25, %v227_v22  ;;  %v391_v29 = vpop.f32.mrb[2].mxu1 }
  0xdd   :  { %v264_v28 = vadd.f32 %v247_v18, %v222_v26  ;;  %v399_v30 = vpop.f32.mrb[2].mxu0  ;;  %v129_v32 = vpop.f32.mrb[3].mxu1 }
  0xde   :  { %427 = vtanh.f32 %v265_v27  ;;  %v237_v31 = vadd.f32 %v399_v30, %v391_v29  ;;  %v231_v33 = vpop.f32.mrb[3].mxu0 }
  0xdf   :  { %429 = vtanh.f32 %v264_v28  ;;  %v232_v35 = vadd.f32 %v231_v33, %v129_v32 }
  0xe0   :  { %v267_v36 = vadd.f32 %v262_v34, %v237_v31 }
  0xe1   :  { %v266_v37 = vadd.f32 %v257_v19, %v232_v35 }
  0xe2   :  { %431 = vtanh.f32 %v267_v36 }
  0xe3   :  { %433 = vtanh.f32 %v266_v37 }
  0xe8   :  { %v428_v38 = vpop.eup %427 }
  0xe9   :  { %v430_v39 = vpop.eup %429 }
  0xea   :  { %v412_v40 = vpack.c.bf16 %v428_v38, %v430_v39 }
  0xec   :  { %v432_v41 = vpop.eup %431  ;;  %413 = vmatpush3.bf16.msra.mxu1 %v412_v40 }
  0xed   :  { %v434_v42 = vpop.eup %433  ;;  %414 = vmatprep.subr.bf16.mxu1 %v436_v16 }
  0xee   :  { %v415_v43 = vpack.c.bf16 %v432_v41, %v434_v42 }
  0xf0   :  { %416 = vmatpush3.bf16.msra.mxu1 %v415_v43 }
  0xf3   :  { %409 = vmatmul.mubr.msk.f32.vlgmr.msra.gmra.mrb[4].mxu1 %vm279_vm5, %v272_v44 }
 0x1c6   :  { %v349_v46 = vpop.f32.mrb[4].mxu1 }
 0x1c7   :  { %v350_v47 = vadd.f32 %v349_v46, %v277_v45  ;;  %v410_v48 = vpop.f32.mrb[5].mxu1 }
 0x1c9   :  { %353 = vst [vmem:[%s549_s7] sm:$0xf] %v350_v47 }

</bundles_post_ra>
